<compile_context>
chip_gen: v7x
topology: tpu7x:2x2x1
jax: 0.10.0
libtpu: 0.0.40
codegen_flags: <defaults>
</compile_context>

<pallas_src>
import jax
import jax.numpy as jnp
from jax.experimental import pallas as pl
from jax.experimental.pallas import tpu as pltpu

CHANNELS = 3
HEIGHT = 32
WIDTH = 32
SIZE = WIDTH * HEIGHT * CHANNELS  # 3072
OUT = 10
TM_MAX = 512  # rows of x per grid step (6 MiB f32 tile; VMEM-safe on all gens)


def _lr_kernel(x_ref, w_ref, b_ref, o_ref):
    """Single-shot per batch tile: logits = x @ W^T + b, then sigmoid."""
    logits = jnp.dot(
        x_ref[...], w_ref[...], preferred_element_type=jnp.float32
    ) + b_ref[...]
    o_ref[...] = jax.nn.sigmoid(logits).astype(o_ref.dtype)


def lr_forward(x, weight_t, bias2d):
    """x: [B, C, H, W] f32; weight_t: [SIZE, 10]; bias2d: [1, 10] -> [B, 10]."""
    b = x.shape[0]
    x2d = x.reshape(b, SIZE)  # same as torch x.view(-1, SIZE)

    tm = min(b, TM_MAX)
    grid = (pl.cdiv(b, tm),)  # batch tiles; (1,) for small B

    return pl.pallas_call(
        _lr_kernel,
        out_shape=jax.ShapeDtypeStruct((b, OUT), x.dtype),
        grid_spec=pltpu.PrefetchScalarGridSpec(
            num_scalar_prefetch=0,
            grid=grid,
            in_specs=[
                pl.BlockSpec((tm, SIZE), lambda i: (i, 0)),    # x row-slab tile
                pl.BlockSpec((SIZE, OUT), lambda i: (0, 0)),   # W^T (resident)
                pl.BlockSpec((1, OUT), lambda i: (0, 0)),      # bias (resident)
            ],
            out_specs=pl.BlockSpec((tm, OUT), lambda i: (i, 0)),
        ),
        compiler_params=pltpu.CompilerParams(
            dimension_semantics=("parallel",),     # independent batch tiles
            vmem_limit_bytes=32 * 1024 * 1024,     # safe on v7x's 64 MiB VMEM
        ),
    )(x2d, weight_t, bias2d)


def init_params(key):
    """Deterministic init mirroring nn.Linear(SIZE, 10) parameter shapes."""
    kw, kb = jax.random.split(key)
    bound = 1.0 / jnp.sqrt(SIZE)
    weight = jax.random.uniform(
        kw, (OUT, SIZE), dtype=jnp.float32, minval=-bound, maxval=bound
    )
    bias = jax.random.uniform(
        kb, (OUT,), dtype=jnp.float32, minval=-bound, maxval=bound
    )
    return weight, bias


def prepare_params(weight, bias):
    """One-time layout prep (hoisted out of the per-forward path)."""
    return weight.T, bias.reshape(1, OUT)  # [SIZE, 10], [1, 10]


if __name__ == "__main__":
    key = jax.random.PRNGKey(0)
    kx, kp = jax.random.split(key)

    batch = 2
    x = jax.random.normal(kx, (batch, CHANNELS, HEIGHT, WIDTH), dtype=jnp.float32)
    weight, bias = init_params(kp)
    weight_t, bias2d = prepare_params(weight, bias)  # done once, not per call

    out = lr_forward(x, weight_t, bias2d)
    out = jax.block_until_ready(out)

    # Reference check in plain JAX.
    ref = jax.nn.sigmoid(x.reshape(batch, SIZE) @ weight.T + bias)
    assert out.shape == (batch, OUT)
    assert jnp.allclose(out, ref, atol=1e-5, rtol=1e-5)

    print("KERNEL_OK")
</pallas_src>

<mosaic_0001>
module attributes {stable_mosaic.version = 11 : i64} {
  func.func @_lr_kernel(%arg0: i32, %arg1: memref<2x3072xf32, #tpu.memory_space<vmem>>, %arg2: memref<3072x10xf32, #tpu.memory_space<vmem>>, %arg3: memref<1x10xf32, #tpu.memory_space<vmem>>, %arg4: memref<2x10xf32, #tpu.memory_space<vmem>>) attributes {dimension_semantics = [#tpu.dimension_semantics<parallel>], iteration_bounds = array<i64: 1>, scalar_prefetch = 0 : i64, scratch_operands = 0 : i64, tpu.core_type = #tpu.core_type<tc>, window_params = [{transform_indices = @transform_0, window_bounds = array<i64: 2, 3072>}, {pipeline_mode = #tpu.pipeline_mode<synchronous>, transform_indices = @transform_1, window_bounds = array<i64: 3072, 10>}, {pipeline_mode = #tpu.pipeline_mode<synchronous>, transform_indices = @transform_2, window_bounds = array<i64: 1, 10>}, {transform_indices = @transform_3, window_bounds = array<i64: 2, 10>}]} {
    %c0 = arith.constant 0 : index
    %c0_0 = arith.constant 0 : index
    %0 = vector.load %arg1[%c0, %c0_0] : memref<2x3072xf32, #tpu.memory_space<vmem>>, vector<2x3072xf32>
    %c0_1 = arith.constant 0 : index
    %c0_2 = arith.constant 0 : index
    %1 = vector.load %arg2[%c0_1, %c0_2] : memref<3072x10xf32, #tpu.memory_space<vmem>>, vector<3072x10xf32>
    %cst = arith.constant dense<0.000000e+00> : vector<2x10xf32>
    %2 = tpu.matmul %0, %1, %cst {dimension_numbers = #tpu.dot_dimension_numbers<[1], [0], [0], [1], [0, 0, 1, 1], [], []>} : vector<2x3072xf32>, vector<3072x10xf32>, vector<2x10xf32> -> vector<2x10xf32>
    %c0_3 = arith.constant 0 : index
    %c0_4 = arith.constant 0 : index
    %3 = vector.load %arg3[%c0_3, %c0_4] : memref<1x10xf32, #tpu.memory_space<vmem>>, vector<1x10xf32>
    %4 = vector.broadcast %3 : vector<1x10xf32> to vector<2x10xf32>
    %5 = arith.addf %2, %4 : vector<2x10xf32>
    %6 = arith.negf %5 : vector<2x10xf32>
    %7 = math.exp %6 : vector<2x10xf32>
    %cst_5 = arith.constant 1.000000e+00 : f32
    %8 = vector.broadcast %cst_5 : f32 to vector<2x10xf32>
    %9 = arith.addf %8, %7 : vector<2x10xf32>
    %10 = arith.divf %8, %9 : vector<2x10xf32>
    %c0_6 = arith.constant 0 : index
    %c0_7 = arith.constant 0 : index
    %11 = vector.load %arg4[%c0_6, %c0_7] : memref<2x10xf32, #tpu.memory_space<vmem>>, vector<2x10xf32>
    tpu.vector_store %arg4[%c0_6, %c0_7], %10 {strides = array<i32>} : memref<2x10xf32, #tpu.memory_space<vmem>>, vector<2x10xf32>,
    return
  }
  func.func @transform_0(%arg0: i32) -> (i32, i32) {
    %c0_i32 = arith.constant 0 : i32
    %c0_i32_0 = arith.constant 0 : i32
    return %arg0, %c0_i32 : i32, i32
  }
  func.func @transform_1(%arg0: i32) -> (i32, i32) {
    %c0_i32 = arith.constant 0 : i32
    %c0_i32_0 = arith.constant 0 : i32
    %c0_i32_1 = arith.constant 0 : i32
    return %c0_i32, %c0_i32_0 : i32, i32
  }
  func.func @transform_2(%arg0: i32) -> (i32, i32) {
    %c0_i32 = arith.constant 0 : i32
    %c0_i32_0 = arith.constant 0 : i32
    %c0_i32_1 = arith.constant 0 : i32
    return %c0_i32, %c0_i32_0 : i32, i32
  }
  func.func @transform_3(%arg0: i32) -> (i32, i32) {
    %c0_i32 = arith.constant 0 : i32
    %c0_i32_0 = arith.constant 0 : i32
    return %arg0, %c0_i32 : i32, i32
  }
}

</mosaic_0001>

<bundles_post_ra>
// kernel: tpu_custom_call.1
= control target key start
LH: loop header
LB: loop body
LE: loop exit
PB: predicated region body
PF: predicated region fallthrough
CT: control target
= control target key end

     0   :  { %v2248_v47 = vmov 1983009808   ;;  %v422_v49 = vlaneseq  ;;  %s3519_s0 = inlined_call_operand.vmem [shape: f32[2,3072], index: 0, kind: input, shape index: {}]   ;;  %s3520_s1 = inlined_call_operand.vmem [shape: f32[3072,10], index: 1, kind: input, shape index: {}]   ;;  %s3521_s2 = inlined_call_operand.vmem [shape: f32[1,10], index: 2, kind: input, shape index: {}]   ;;  %s3522_s3 = inlined_call_operand.hbm [shape: f32[2,10], index: 3, kind: output, shape index: {}]  }
   0x1   :  { %v37_v0 = vld [vmem:[%s3520_s1 + $0x80] sm:$0xff]  ;;  %v38_v1 = vld [vmem:[%s3520_s1 + $0x88] sm:$0xff]  ;;  %v39_v11 = vld [vmem:[%s3520_s1 + $0x90] sm:$0xff]  ;;  %v420_v48 = vunpack.c.l.s4 %v2248_v47 }
   0x2   :  { %v21_v2 = vld [vmem:[%s3520_s1] sm:$0xff]  ;;  %v1828_v3 = vpack.c.bf16 %v38_v1, %v37_v0  ;;  %v22_v4 = vld [vmem:[%s3520_s1 + $0x8] sm:$0xff]  ;;  %v40_v13 = vld [vmem:[%s3520_s1 + $0x98] sm:$0xff]  ;;  %v423_v0 = vshrl.u32 %v422_v49, 7 }
   0x3   :  { %v69_v5 = vld [vmem:[%s3520_s1 + $0x180] sm:$0xff]  ;;  %v70_v6 = vld [vmem:[%s3520_s1 + $0x188] sm:$0xff]  ;;  %v1830_v7 = vpack.c.bf16 %v22_v4, %v21_v2  ;;  %v23_v14 = vld [vmem:[%s3520_s1 + $0x10] sm:$0xff]  ;;  %v1832_v16 = vpack.c.bf16 %v40_v13, %v39_v11  ;;  %v421_v63 = vunpack.c.0.s8 %v420_v48 }
   0x4   :  { %v1860_v8 = vpack.c.bf16 %v70_v6, %v69_v5  ;;  %v53_v9 = vld [vmem:[%s3520_s1 + $0x100] sm:$0xff]  ;;  %v54_v10 = vld [vmem:[%s3520_s1 + $0x108] sm:$0xff]  ;;  %1829 = vmatprep.subr.bf16.mxu0 %v1828_v3  ;;  %v24_v15 = vld [vmem:[%s3520_s1 + $0x18] sm:$0xff] }
   0x5   :  { %v1862_v12 = vpack.c.bf16 %v54_v10, %v53_v9  ;;  %1831 = vmatpush3.bf16.msra.mxu0 %v1830_v7  ;;  %v1834_v17 = vpack.c.bf16 %v24_v15, %v23_v14  ;;  %v71_v18 = vld [vmem:[%s3520_s1 + $0x190] sm:$0xff]  ;;  %v72_v19 = vld [vmem:[%s3520_s1 + $0x198] sm:$0xff]  ;;  %v41_v23 = vld [vmem:[%s3520_s1 + $0xa0] sm:$0xff]  ;;  %v2420_v13 = vsub.s32 %v421_v63, %v423_v0 }
   0x6   :  { %1861 = vmatprep.subr.bf16.mxu1 %v1860_v8  ;;  %v55_v20 = vld [vmem:[%s3520_s1 + $0x110] sm:$0xff]  ;;  %v1864_v21 = vpack.c.bf16 %v72_v19, %v71_v18  ;;  %v56_v22 = vld [vmem:[%s3520_s1 + $0x118] sm:$0xff]  ;;  %v42_v24 = vld [vmem:[%s3520_s1 + $0xa8] sm:$0xff]  ;;  %1833 = vmatprep.subr.bf16.mxu0 %v1832_v16 }
   0x7   :  { %1863 = vmatpush3.bf16.msra.mxu1 %v1862_v12  ;;  %v1866_v25 = vpack.c.bf16 %v56_v22, %v55_v20  ;;  %v1836_v26 = vpack.c.bf16 %v42_v24, %v41_v23  ;;  %v25_v27 = vld [vmem:[%s3520_s1 + $0x20] sm:$0xff]  ;;  %v26_v28 = vld [vmem:[%s3520_s1 + $0x28] sm:$0xff]  ;;  %v43_v35 = vld [vmem:[%s3520_s1 + $0xb0] sm:$0xff] }
   0x8   :  { %v73_v29 = vld [vmem:[%s3520_s1 + $0x1a0] sm:$0xff]  ;;  %1865 = vmatprep.subr.bf16.mxu1 %v1864_v21  ;;  %v74_v30 = vld [vmem:[%s3520_s1 + $0x1a8] sm:$0xff]  ;;  %v1838_v33 = vpack.c.bf16 %v26_v28, %v25_v27  ;;  %v44_v36 = vld [vmem:[%s3520_s1 + $0xb8] sm:$0xff] }
   0x9   :  { %v57_v31 = vld [vmem:[%s3520_s1 + $0x120] sm:$0xff]  ;;  %v58_v32 = vld [vmem:[%s3520_s1 + $0x128] sm:$0xff]  ;;  %1835 = vmatpush3.bf16.msra.mxu0 %v1834_v17  ;;  %v1868_v34 = vpack.c.bf16 %v74_v30, %v73_v29  ;;  %v27_v37 = vld [vmem:[%s3520_s1 + $0x30] sm:$0xff]  ;;  %v1840_v39 = vpack.c.bf16 %v44_v36, %v43_v35 }
   0xa   :  { %1837 = vmatprep.subr.bf16.mxu0 %v1836_v26  ;;  %v1870_v38 = vpack.c.bf16 %v58_v32, %v57_v31  ;;  %v28_v40 = vld [vmem:[%s3520_s1 + $0x38] sm:$0xff]  ;;  %v75_v41 = vld [vmem:[%s3520_s1 + $0x1b0] sm:$0xff]  ;;  %v45_v46 = vld [vmem:[%s3520_s1 + $0xc0] sm:$0xff] }
   0xb   :  { %1867 = vmatpush3.bf16.msra.mxu1 %v1866_v25  ;;  %v76_v42 = vld [vmem:[%s3520_s1 + $0x1b8] sm:$0xff]  ;;  %v59_v44 = vld [vmem:[%s3520_s1 + $0x130] sm:$0xff]  ;;  %v46_v50 = vld [vmem:[%s3520_s1 + $0xc8] sm:$0xff]  ;;  %v1842_v51 = vpack.c.bf16 %v28_v40, %v27_v37 }
   0xc   :  { %1869 = vmatprep.subr.bf16.mxu1 %v1868_v34  ;;  %v1872_v43 = vpack.c.bf16 %v76_v42, %v75_v41  ;;  %v60_v45 = vld [vmem:[%s3520_s1 + $0x138] sm:$0xff]  ;;  %v77_v52 = vld [vmem:[%s3520_s1 + $0x1c0] sm:$0xff]  ;;  %v78_v53 = vld [vmem:[%s3520_s1 + $0x1c8] sm:$0xff]  ;;  %v1844_v55 = vpack.c.bf16 %v46_v50, %v45_v46 }
   0xd   :  { %1839 = vmatpush3.bf16.msra.mxu0 %v1838_v33  ;;  %v1874_v54 = vpack.c.bf16 %v60_v45, %v59_v44  ;;  %v29_v56 = vld [vmem:[%s3520_s1 + $0x40] sm:$0xff]  ;;  %v30_v57 = vld [vmem:[%s3520_s1 + $0x48] sm:$0xff]  ;;  %v1876_v59 = vpack.c.bf16 %v78_v53, %v77_v52  ;;  %v47_v61 = vld [vmem:[%s3520_s1 + $0xd0] sm:$0xff] }
   0xe   :  { %1841 = vmatprep.subr.bf16.mxu0 %v1840_v39  ;;  %v61_v58 = vld [vmem:[%s3520_s1 + $0x140] sm:$0xff]  ;;  %v62_v60 = vld [vmem:[%s3520_s1 + $0x148] sm:$0xff]  ;;  %v48_v62 = vld [vmem:[%s3520_s1 + $0xd8] sm:$0xff]  ;;  %v1846_v3 = vpack.c.bf16 %v30_v57, %v29_v56 }
   0xf   :  { %1871 = vmatpush3.bf16.msra.mxu1 %v1870_v38  ;;  %v79_v1 = vld [vmem:[%s3520_s1 + $0x1d0] sm:$0xff]  ;;  %v80_v2 = vld [vmem:[%s3520_s1 + $0x1d8] sm:$0xff]  ;;  %v1878_v4 = vpack.c.bf16 %v62_v60, %v61_v58  ;;  %v1848_v5 = vpack.c.bf16 %v48_v62, %v47_v61  ;;  %v49_v11 = vld [vmem:[%s3520_s1 + $0xe0] sm:$0xff] }
  0x10   :  { %1873 = vmatprep.subr.bf16.mxu1 %v1872_v43  ;;  %v31_v6 = vld [vmem:[%s3520_s1 + $0x50] sm:$0xff]  ;;  %v32_v7 = vld [vmem:[%s3520_s1 + $0x58] sm:$0xff]  ;;  %v1880_v9 = vpack.c.bf16 %v80_v2, %v79_v1  ;;  %v50_v12 = vld [vmem:[%s3520_s1 + $0xe8] sm:$0xff] }
  0x11   :  { %1843 = vmatpush3.bf16.msra.mxu0 %v1842_v51  ;;  %v63_v8 = vld [vmem:[%s3520_s1 + $0x150] sm:$0xff]  ;;  %v64_v10 = vld [vmem:[%s3520_s1 + $0x158] sm:$0xff]  ;;  %v81_v14 = vld [vmem:[%s3520_s1 + $0x1e0] sm:$0xff]  ;;  %v1850_v16 = vpack.c.bf16 %v32_v7, %v31_v6  ;;  %v1852_v19 = vpack.c.bf16 %v50_v12, %v49_v11 }
  0x12   :  { %1845 = vmatprep.subr.bf16.mxu0 %v1844_v55  ;;  %v82_v15 = vld [vmem:[%s3520_s1 + $0x1e8] sm:$0xff]  ;;  %v33_v17 = vld [vmem:[%s3520_s1 + $0x60] sm:$0xff]  ;;  %v1882_v18 = vpack.c.bf16 %v64_v10, %v63_v8  ;;  %v51_v25 = vld [vmem:[%s3520_s1 + $0xf0] sm:$0xff] }
  0x13   :  { %1875 = vmatpush3.bf16.msra.mxu1 %v1874_v54  ;;  %v34_v20 = vld [vmem:[%s3520_s1 + $0x68] sm:$0xff]  ;;  %v65_v21 = vld [vmem:[%s3520_s1 + $0x160] sm:$0xff]  ;;  %v1884_v23 = vpack.c.bf16 %v82_v15, %v81_v14  ;;  %v52_v26 = vld [vmem:[%s3520_s1 + $0xf8] sm:$0xff] }
  0x14   :  { %1877 = vmatprep.subr.bf16.mxu1 %v1876_v59  ;;  %v15_v22 = vld [vmem:[%s3519_s0] sm:$0xff]  ;;  %v66_v24 = vld [vmem:[%s3520_s1 + $0x168] sm:$0xff]  ;;  %v83_v29 = vld [vmem:[%s3520_s1 + $0x1f0] sm:$0xff]  ;;  %v1854_v31 = vpack.c.bf16 %v34_v20, %v33_v17  ;;  %v1856_v35 = vpack.c.bf16 %v52_v26, %v51_v25 }
  0x15   :  { %1847 = vmatpush3.bf16.msra.mxu0 %v1846_v3  ;;  %v425_v27 = vrot.slane %v15_v22, %v2420_v13  ;;  %v418_v28 = vcombine.high %v15_v22, %v15_v22  ;;  %v84_v30 = vld [vmem:[%s3520_s1 + $0x1f8] sm:$0xff]  ;;  %v1886_v34 = vpack.c.bf16 %v66_v24, %v65_v21  ;;  %v35_v36 = vld [vmem:[%s3520_s1 + $0x70] sm:$0xff]  ;;  %v101_v41 = vld [vmem:[%s3520_s1 + $0x280] sm:$0xff] }
  0x16   :  { %1849 = vmatprep.subr.bf16.mxu0 %v1848_v5  ;;  %v36_v37 = vld [vmem:[%s3520_s1 + $0x78] sm:$0xff]  ;;  %v67_v38 = vld [vmem:[%s3520_s1 + $0x170] sm:$0xff]  ;;  %v1888_v39 = vpack.c.bf16 %v84_v30, %v83_v29  ;;  %v102_v42 = vld [vmem:[%s3520_s1 + $0x288] sm:$0xff] }
  0x17   :  { %1879 = vmatpush3.bf16.msra.mxu1 %v1878_v4  ;;  %v433_v32 = vcombine.high %v425_v27, %v425_v27  ;;  %v432_v33 = vrot.slane %v418_v28, %v2420_v13  ;;  %v68_v40 = vld [vmem:[%s3520_s1 + $0x178] sm:$0xff]  ;;  %v133_v44 = vld [vmem:[%s3520_s1 + $0x380] sm:$0xff]  ;;  %v134_v45 = vld [vmem:[%s3520_s1 + $0x388] sm:$0xff]  ;;  %v1858_v46 = vpack.c.bf16 %v36_v37, %v35_v36  ;;  %v1892_v48 = vpack.c.bf16 %v102_v42, %v101_v41 }
  0x18   :  { %1881 = vmatprep.subr.bf16.mxu1 %v1880_v9  ;;  %v1890_v47 = vpack.c.bf16 %v68_v40, %v67_v38  ;;  %v85_v49 = vld [vmem:[%s3520_s1 + $0x200] sm:$0xff]  ;;  %v86_v50 = vld [vmem:[%s3520_s1 + $0x208] sm:$0xff]  ;;  %v1924_v52 = vpack.c.bf16 %v134_v45, %v133_v44  ;;  %v103_v54 = vld [vmem:[%s3520_s1 + $0x290] sm:$0xff] }
  0x19   :  { %1851 = vmatpush3.bf16.msra.mxu0 %v1850_v16  ;;  %608 = vmatprep.mubr.f32.mxu0 %v433_v32  ;;  %v434_v43 = vcombine.high %v432_v33, %v432_v33  ;;  %v117_v51 = vld [vmem:[%s3520_s1 + $0x300] sm:$0xff]  ;;  %v118_v53 = vld [vmem:[%s3520_s1 + $0x308] sm:$0xff]  ;;  %v104_v55 = vld [vmem:[%s3520_s1 + $0x298] sm:$0xff]  ;;  %v1894_v58 = vpack.c.bf16 %v86_v50, %v85_v49 }
  0x1a   :  { %1853 = vmatprep.subr.bf16.mxu0 %v1852_v19  ;;  %v135_v56 = vld [vmem:[%s3520_s1 + $0x390] sm:$0xff]  ;;  %v136_v57 = vld [vmem:[%s3520_s1 + $0x398] sm:$0xff]  ;;  %v1926_v59 = vpack.c.bf16 %v118_v53, %v117_v51  ;;  %v1896_v60 = vpack.c.bf16 %v104_v55, %v103_v54  ;;  %v105_v2 = vld [vmem:[%s3520_s1 + $0x2a0] sm:$0xff] }
  0x1b   :  { %1883 = vmatpush3.bf16.msra.mxu1 %v1882_v18  ;;  %678 = vmatprep.mubr.f32.mxu1 %v434_v43  ;;  %v87_v61 = vld [vmem:[%s3520_s1 + $0x210] sm:$0xff]  ;;  %v88_v62 = vld [vmem:[%s3520_s1 + $0x218] sm:$0xff]  ;;  %v1928_v0 = vpack.c.bf16 %v136_v57, %v135_v56  ;;  %v106_v3 = vld [vmem:[%s3520_s1 + $0x2a8] sm:$0xff] }
  0x1c   :  { %1885 = vmatprep.subr.bf16.mxu1 %v1884_v23  ;;  %v119_v63 = vld [vmem:[%s3520_s1 + $0x310] sm:$0xff]  ;;  %v120_v1 = vld [vmem:[%s3520_s1 + $0x318] sm:$0xff]  ;;  %v137_v4 = vld [vmem:[%s3520_s1 + $0x3a0] sm:$0xff]  ;;  %v1898_v6 = vpack.c.bf16 %v88_v62, %v87_v61  ;;  %v1900_v8 = vpack.c.bf16 %v106_v3, %v105_v2 }
  0x1d   :  { %1855 = vmatpush3.bf16.msra.mxu0 %v1854_v31  ;;  %v138_v5 = vld [vmem:[%s3520_s1 + $0x3a8] sm:$0xff]  ;;  %v1930_v7 = vpack.c.bf16 %v120_v1, %v119_v63  ;;  %v89_v9 = vld [vmem:[%s3520_s1 + $0x220] sm:$0xff]  ;;  %v107_v15 = vld [vmem:[%s3520_s1 + $0x2b0] sm:$0xff] }
  0x1e   :  { %1857 = vmatprep.subr.bf16.mxu0 %v1856_v35  ;;  %v90_v10 = vld [vmem:[%s3520_s1 + $0x228] sm:$0xff]  ;;  %v121_v11 = vld [vmem:[%s3520_s1 + $0x320] sm:$0xff]  ;;  %v1932_v12 = vpack.c.bf16 %v138_v5, %v137_v4  ;;  %v108_v16 = vld [vmem:[%s3520_s1 + $0x2b8] sm:$0xff] }
  0x1f   :  { %1887 = vmatpush3.bf16.msra.mxu1 %v1886_v34  ;;  %v122_v14 = vld [vmem:[%s3520_s1 + $0x328] sm:$0xff]  ;;  %v139_v17 = vld [vmem:[%s3520_s1 + $0x3b0] sm:$0xff]  ;;  %v140_v18 = vld [vmem:[%s3520_s1 + $0x3b8] sm:$0xff]  ;;  %v1902_v19 = vpack.c.bf16 %v90_v10, %v89_v9  ;;  %v1904_v21 = vpack.c.bf16 %v108_v16, %v107_v15 }
  0x20   :  { %1889 = vmatprep.subr.bf16.mxu1 %v1888_v39  ;;  %v1934_v20 = vpack.c.bf16 %v122_v14, %v121_v11  ;;  %v91_v22 = vld [vmem:[%s3520_s1 + $0x230] sm:$0xff]  ;;  %v92_v23 = vld [vmem:[%s3520_s1 + $0x238] sm:$0xff]  ;;  %v1936_v25 = vpack.c.bf16 %v140_v18, %v139_v17  ;;  %v110_v28 = vld [vmem:[%s3520_s1 + $0x2c8] sm:$0xff] }
  0x21   :  { %1859 = vmatpush3.bf16.msra.mxu0 %v1858_v46  ;;  %v123_v24 = vld [vmem:[%s3520_s1 + $0x330] sm:$0xff]  ;;  %v124_v26 = vld [vmem:[%s3520_s1 + $0x338] sm:$0xff]  ;;  %v141_v29 = vld [vmem:[%s3520_s1 + $0x3c0] sm:$0xff]  ;;  %v1906_v32 = vpack.c.bf16 %v92_v23, %v91_v22 }
  0x22   :  { %1893 = vmatprep.subr.bf16.mxu0 %v1892_v48  ;;  %v142_v30 = vld [vmem:[%s3520_s1 + $0x3c8] sm:$0xff]  ;;  %v1938_v35 = vpack.c.bf16 %v124_v26, %v123_v24  ;;  %v93_v37 = vld [vmem:[%s3520_s1 + $0x240] sm:$0xff]  ;;  %v111_v42 = vld [vmem:[%s3520_s1 + $0x2d0] sm:$0xff] }
  0x23   :  { %1891 = vmatpush3.bf16.msra.mxu1 %v1890_v47  ;;  %v16_v31 = vld [vmem:[%s3519_s0 + $0x8] sm:$0xff]  ;;  %v125_v39 = vld [vmem:[%s3520_s1 + $0x340] sm:$0xff]  ;;  %v1940_v40 = vpack.c.bf16 %v142_v30, %v141_v29  ;;  %v112_v43 = vld [vmem:[%s3520_s1 + $0x2d8] sm:$0xff] }
  0x24   :  { %1925 = vmatprep.subr.bf16.mxu1 %v1924_v52  ;;  %609 = vmatmul.mubr.f32.vlgmr.msra.gmra.mrb[0].mxu0 %v425_v27  ;;  %v109_v27 = vld [vmem:[%s3520_s1 + $0x2c0] sm:$0xff]  ;;  %v435_v34 = vcombine.high %v16_v31, %v16_v31  ;;  %v94_v38 = vld [vmem:[%s3520_s1 + $0x248] sm:$0xff]  ;;  %v143_v46 = vld [vmem:[%s3520_s1 + $0x3d0] sm:$0xff]  ;;  %v1912_v51 = vpack.c.bf16 %v112_v43, %v111_v42 }
  0x25   :  { %1895 = vmatpush3.bf16.msra.mxu0 %v1894_v58  ;;  %v1908_v36 = vpack.c.bf16 %v110_v28, %v109_v27  ;;  %v126_v41 = vld [vmem:[%s3520_s1 + $0x348] sm:$0xff]  ;;  %v144_v47 = vld [vmem:[%s3520_s1 + $0x3d8] sm:$0xff]  ;;  %v1910_v48 = vpack.c.bf16 %v94_v38, %v93_v37  ;;  %v95_v52 = vld [vmem:[%s3520_s1 + $0x250] sm:$0xff] }
  0x26   :  { %679 = vmatmul.mubr.f32.vlgmr.msra.gmra.mrb[0].mxu1 %v432_v33  ;;  %1897 = vmatprep.subr.bf16.mxu0 %v1896_v60  ;;  %v2581_v33 = vrot.slane %v16_v31, %v2420_v13  ;;  %v2604_v45 = vrot.slane %v435_v34, %v2420_v13  ;;  %v1942_v50 = vpack.c.bf16 %v126_v41, %v125_v39  ;;  %v96_v53 = vld [vmem:[%s3520_s1 + $0x258] sm:$0xff]  ;;  %v127_v54 = vld [vmem:[%s3520_s1 + $0x350] sm:$0xff]  ;;  %v113_v57 = vld [vmem:[%s3520_s1 + $0x2e0] sm:$0xff] }
  0x27   :  { %1927 = vmatpush3.bf16.msra.mxu1 %v1926_v59  ;;  %v1944_v55 = vpack.c.bf16 %v144_v47, %v143_v46  ;;  %v128_v56 = vld [vmem:[%s3520_s1 + $0x358] sm:$0xff]  ;;  %v114_v58 = vld [vmem:[%s3520_s1 + $0x2e8] sm:$0xff]  ;;  %v145_v59 = vld [vmem:[%s3520_s1 + $0x3e0] sm:$0xff]  ;;  %v1914_v61 = vpack.c.bf16 %v96_v53, %v95_v52 }
  0x28   :  { %1929 = vmatprep.subr.bf16.mxu1 %v1928_v0  ;;  %v450_v44 = vcombine.high %v2581_v33, %v2581_v33  ;;  %v451_v49 = vcombine.high %v2604_v45, %v2604_v45  ;;  %v146_v60 = vld [vmem:[%s3520_s1 + $0x3e8] sm:$0xff]  ;;  %v1946_v62 = vpack.c.bf16 %v128_v56, %v127_v54  ;;  %v1916_v63 = vpack.c.bf16 %v114_v58, %v113_v57  ;;  %v97_v0 = vld [vmem:[%s3520_s1 + $0x260] sm:$0xff]  ;;  %v115_v5 = vld [vmem:[%s3520_s1 + $0x2f0] sm:$0xff] }
  0x29   :  { %1899 = vmatpush3.bf16.msra.mxu0 %v1898_v6  ;;  %v98_v1 = vld [vmem:[%s3520_s1 + $0x268] sm:$0xff]  ;;  %v129_v2 = vld [vmem:[%s3520_s1 + $0x360] sm:$0xff]  ;;  %v1948_v3 = vpack.c.bf16 %v146_v60, %v145_v59  ;;  %v116_v6 = vld [vmem:[%s3520_s1 + $0x2f8] sm:$0xff] }
  0x2a   :  { %1901 = vmatprep.subr.bf16.mxu0 %v1900_v8  ;;  %748 = vmatprep.mubr.f32.mxu0 %v450_v44  ;;  %v130_v4 = vld [vmem:[%s3520_s1 + $0x368] sm:$0xff]  ;;  %v148_v8 = vld [vmem:[%s3520_s1 + $0x3f8] sm:$0xff]  ;;  %v1918_v9 = vpack.c.bf16 %v98_v1, %v97_v0  ;;  %v1920_v11 = vpack.c.bf16 %v116_v6, %v115_v5  ;;  %v131_v15 = vld [vmem:[%s3520_s1 + $0x370] sm:$0xff] }
  0x2b   :  { %1931 = vmatpush3.bf16.msra.mxu1 %v1930_v7  ;;  %818 = vmatprep.mubr.f32.mxu1 %v451_v49  ;;  %v147_v7 = vld [vmem:[%s3520_s1 + $0x3f0] sm:$0xff]  ;;  %v1950_v10 = vpack.c.bf16 %v130_v4, %v129_v2  ;;  %v100_v14 = vld [vmem:[%s3520_s1 + $0x278] sm:$0xff]  ;;  %v165_v18 = vld [vmem:[%s3520_s1 + $0x480] sm:$0xff] }
  0x2c   :  { %1933 = vmatprep.subr.bf16.mxu1 %v1932_v12  ;;  %v99_v12 = vld [vmem:[%s3520_s1 + $0x270] sm:$0xff]  ;;  %v1952_v16 = vpack.c.bf16 %v148_v8, %v147_v7  ;;  %v132_v17 = vld [vmem:[%s3520_s1 + $0x378] sm:$0xff]  ;;  %v149_v23 = vld [vmem:[%s3520_s1 + $0x400] sm:$0xff] }
  0x2d   :  { %1903 = vmatpush3.bf16.msra.mxu0 %v1902_v19  ;;  %v166_v19 = vld [vmem:[%s3520_s1 + $0x488] sm:$0xff]  ;;  %v1922_v22 = vpack.c.bf16 %v100_v14, %v99_v12  ;;  %v1954_v24 = vpack.c.bf16 %v132_v17, %v131_v15  ;;  %v181_v27 = vld [vmem:[%s3520_s1 + $0x500] sm:$0xff]  ;;  %v167_v30 = vld [vmem:[%s3520_s1 + $0x490] sm:$0xff] }
  0x2e   :  { %1905 = vmatprep.subr.bf16.mxu0 %v1904_v21  ;;  %v198_v21 = vld [vmem:[%s3520_s1 + $0x588] sm:$0xff]  ;;  %v168_v31 = vld [vmem:[%s3520_s1 + $0x498] sm:$0xff]  ;;  %v17_v37 = vld [vmem:[%s3519_s0 + $0x10] sm:$0xff] }
  0x2f   :  { %1935 = vmatpush3.bf16.msra.mxu1 %v1934_v20  ;;  %v197_v20 = vld [vmem:[%s3520_s1 + $0x580] sm:$0xff]  ;;  %v150_v26 = vld [vmem:[%s3520_s1 + $0x408] sm:$0xff]  ;;  %v200_v34 = vld [vmem:[%s3520_s1 + $0x598] sm:$0xff]  ;;  %v1960_v38 = vpack.c.bf16 %v168_v31, %v167_v30  ;;  %v2723_v42 = vrot.slane %v17_v37, %v2420_v13  ;;  %v452_v43 = vcombine.high %v17_v37, %v17_v37 }
  0x30   :  { %1937 = vmatprep.subr.bf16.mxu1 %v1936_v25  ;;  %v1956_v25 = vpack.c.bf16 %v166_v19, %v165_v18  ;;  %v182_v28 = vld [vmem:[%s3520_s1 + $0x508] sm:$0xff]  ;;  %v1988_v29 = vpack.c.bf16 %v198_v21, %v197_v20  ;;  %v151_v39 = vld [vmem:[%s3520_s1 + $0x410] sm:$0xff]  ;;  %v184_v46 = vld [vmem:[%s3520_s1 + $0x518] sm:$0xff] }
  0x31   :  { %1907 = vmatpush3.bf16.msra.mxu0 %v1906_v32  ;;  %v199_v32 = vld [vmem:[%s3520_s1 + $0x590] sm:$0xff]  ;;  %v169_v47 = vld [vmem:[%s3520_s1 + $0x4a0] sm:$0xff]  ;;  %v2744_v52 = vrot.slane %v452_v43, %v2420_v13  ;;  %v154_v56 = vld [vmem:[%s3520_s1 + $0x428] sm:$0xff] }
  0x32   :  { %1909 = vmatprep.subr.bf16.mxu0 %v1908_v36  ;;  %v1990_v36 = vpack.c.bf16 %v182_v28, %v181_v27  ;;  %v183_v41 = vld [vmem:[%s3520_s1 + $0x510] sm:$0xff]  ;;  %v1992_v44 = vpack.c.bf16 %v200_v34, %v199_v32  ;;  %v201_v49 = vld [vmem:[%s3520_s1 + $0x5a0] sm:$0xff]  ;;  %v186_v59 = vld [vmem:[%s3520_s1 + $0x528] sm:$0xff] }
  0x33   :  { %1939 = vmatpush3.bf16.msra.mxu1 %v1938_v35  ;;  %v1958_v35 = vpack.c.bf16 %v150_v26, %v149_v23  ;;  %v185_v57 = vld [vmem:[%s3520_s1 + $0x520] sm:$0xff]  ;;  %v171_v60 = vld [vmem:[%s3520_s1 + $0x4b0] sm:$0xff]  ;;  %v156_v4 = vld [vmem:[%s3520_s1 + $0x438] sm:$0xff] }
  0x34   :  { %1941 = vmatprep.subr.bf16.mxu1 %v1940_v40  ;;  %v152_v40 = vld [vmem:[%s3520_s1 + $0x418] sm:$0xff]  ;;  %v1998_v1 = vpack.c.bf16 %v186_v59, %v185_v57  ;;  %v187_v5 = vld [vmem:[%s3520_s1 + $0x530] sm:$0xff]  ;;  %v173_v8 = vld [vmem:[%s3520_s1 + $0x4c0] sm:$0xff] }
  0x35   :  { %1911 = vmatpush3.bf16.msra.mxu0 %v1910_v48  ;;  %v170_v48 = vld [vmem:[%s3520_s1 + $0x4a8] sm:$0xff]  ;;  %v1962_v53 = vpack.c.bf16 %v152_v40, %v151_v39  ;;  %v188_v7 = vld [vmem:[%s3520_s1 + $0x538] sm:$0xff]  ;;  %v189_v18 = vld [vmem:[%s3520_s1 + $0x540] sm:$0xff] }
  0x36   :  { %1913 = vmatprep.subr.bf16.mxu0 %v1912_v51  ;;  %v467_v51 = vcombine.high %v2723_v42, %v2723_v42  ;;  %v1964_v54 = vpack.c.bf16 %v170_v48, %v169_v47  ;;  %v2002_v14 = vpack.c.bf16 %v188_v7, %v187_v5  ;;  %v158_v17 = vld [vmem:[%s3520_s1 + $0x448] sm:$0xff]  ;;  %v175_v21 = vld [vmem:[%s3520_s1 + $0x4d0] sm:$0xff]  ;;  %v192_v32 = vld [vmem:[%s3520_s1 + $0x558] sm:$0xff] }
  0x37   :  { %1943 = vmatpush3.bf16.msra.mxu1 %v1942_v50  ;;  %v202_v50 = vld [vmem:[%s3520_s1 + $0x5a8] sm:$0xff]  ;;  %v207_v23 = vld [vmem:[%s3520_s1 + $0x5d0] sm:$0xff]  ;;  %v177_v34 = vld [vmem:[%s3520_s1 + $0x4e0] sm:$0xff] }
  0x38   :  { %1945 = vmatprep.subr.bf16.mxu1 %v1944_v55  ;;  %v153_v55 = vld [vmem:[%s3520_s1 + $0x420] sm:$0xff]  ;;  %v1996_v58 = vpack.c.bf16 %v202_v50, %v201_v49  ;;  %v190_v20 = vld [vmem:[%s3520_s1 + $0x548] sm:$0xff]  ;;  %v159_v28 = vld [vmem:[%s3520_s1 + $0x450] sm:$0xff] }
  0x39   :  { %1915 = vmatpush3.bf16.msra.mxu0 %v1914_v61  ;;  %v172_v61 = vld [vmem:[%s3520_s1 + $0x4b8] sm:$0xff]  ;;  %v1966_v0 = vpack.c.bf16 %v154_v56, %v153_v55  ;;  %v2006_v26 = vpack.c.bf16 %v190_v20, %v189_v18  ;;  %v191_v30 = vld [vmem:[%s3520_s1 + $0x550] sm:$0xff]  ;;  %v210_v37 = vld [vmem:[%s3520_s1 + $0x5e8] sm:$0xff] }
  0x3a   :  { %1917 = vmatprep.subr.bf16.mxu0 %v1916_v63  ;;  %v204_v63 = vld [vmem:[%s3520_s1 + $0x5b8] sm:$0xff]  ;;  %v1968_v2 = vpack.c.bf16 %v172_v61, %v171_v60  ;;  %v2010_v39 = vpack.c.bf16 %v192_v32, %v191_v30  ;;  %v162_v43 = vld [vmem:[%s3520_s1 + $0x468] sm:$0xff]  ;;  %v179_v48 = vld [vmem:[%s3520_s1 + $0x4f0] sm:$0xff] }
  0x3b   :  { %1947 = vmatpush3.bf16.msra.mxu1 %v1946_v62  ;;  %v203_v62 = vld [vmem:[%s3520_s1 + $0x5b0] sm:$0xff]  ;;  %v194_v47 = vld [vmem:[%s3520_s1 + $0x568] sm:$0xff]  ;;  %v180_v49 = vld [vmem:[%s3520_s1 + $0x4f8] sm:$0xff] }
  0x3c   :  { %1949 = vmatprep.subr.bf16.mxu1 %v1948_v3  ;;  %v155_v3 = vld [vmem:[%s3520_s1 + $0x430] sm:$0xff]  ;;  %v2000_v6 = vpack.c.bf16 %v204_v63, %v203_v62  ;;  %v1984_v55 = vpack.c.bf16 %v180_v49, %v179_v48  ;;  %v164_v57 = vld [vmem:[%s3520_s1 + $0x478] sm:$0xff]  ;;  %v229_v60 = vld [vmem:[%s3520_s1 + $0x680] sm:$0xff] }
  0x3d   :  { %1919 = vmatpush3.bf16.msra.mxu0 %v1918_v9  ;;  %v174_v9 = vld [vmem:[%s3520_s1 + $0x4c8] sm:$0xff]  ;;  %v1970_v12 = vpack.c.bf16 %v156_v4, %v155_v3  ;;  %v211_v50 = vld [vmem:[%s3520_s1 + $0x5f0] sm:$0xff]  ;;  %v196_v59 = vld [vmem:[%s3520_s1 + $0x578] sm:$0xff] }
  0x3e   :  { %1921 = vmatprep.subr.bf16.mxu0 %v1920_v11  ;;  %v206_v11 = vld [vmem:[%s3520_s1 + $0x5c8] sm:$0xff]  ;;  %v1972_v15 = vpack.c.bf16 %v174_v9, %v173_v8  ;;  %v163_v56 = vld [vmem:[%s3520_s1 + $0x470] sm:$0xff]  ;;  %v261_v62 = vld [vmem:[%s3520_s1 + $0x780] sm:$0xff] }
  0x3f   :  { %1951 = vmatpush3.bf16.msra.mxu1 %v1950_v10  ;;  %v205_v10 = vld [vmem:[%s3520_s1 + $0x5c0] sm:$0xff]  ;;  %v230_v61 = vld [vmem:[%s3520_s1 + $0x688] sm:$0xff]  ;;  %v231_v9 = vld [vmem:[%s3520_s1 + $0x690] sm:$0xff] }
  0x40   :  { %1953 = vmatprep.subr.bf16.mxu1 %v1952_v16  ;;  %v157_v16 = vld [vmem:[%s3520_s1 + $0x440] sm:$0xff]  ;;  %v2004_v19 = vpack.c.bf16 %v206_v11, %v205_v10  ;;  %v262_v63 = vld [vmem:[%s3520_s1 + $0x788] sm:$0xff]  ;;  %v2020_v3 = vpack.c.bf16 %v230_v61, %v229_v60  ;;  %v232_v10 = vld [vmem:[%s3520_s1 + $0x698] sm:$0xff] }
  0x41   :  { %1923 = vmatpush3.bf16.msra.mxu0 %v1922_v22  ;;  %v176_v22 = vld [vmem:[%s3520_s1 + $0x4d8] sm:$0xff]  ;;  %v213_v4 = vld [vmem:[%s3520_s1 + $0x600] sm:$0xff]  ;;  %v214_v5 = vld [vmem:[%s3520_s1 + $0x608] sm:$0xff]  ;;  %v2052_v7 = vpack.c.bf16 %v262_v63, %v261_v62  ;;  %v2024_v18 = vpack.c.bf16 %v232_v10, %v231_v9 }
  0x42   :  { %1957 = vmatprep.subr.bf16.mxu0 %v1956_v25  ;;  %v1974_v25 = vpack.c.bf16 %v158_v17, %v157_v16  ;;  %v1976_v27 = vpack.c.bf16 %v176_v22, %v175_v21  ;;  %v246_v8 = vld [vmem:[%s3520_s1 + $0x708] sm:$0xff]  ;;  %v2022_v16 = vpack.c.bf16 %v214_v5, %v213_v4  ;;  %v216_v20 = vld [vmem:[%s3520_s1 + $0x618] sm:$0xff]  ;;  %v247_v21 = vld [vmem:[%s3520_s1 + $0x710] sm:$0xff] }
  0x43   :  { %1955 = vmatpush3.bf16.msra.mxu1 %v1954_v24  ;;  %v208_v24 = vld [vmem:[%s3520_s1 + $0x5d8] sm:$0xff]  ;;  %v251_v48 = vld [vmem:[%s3520_s1 + $0x730] sm:$0xff]  ;;  %v254_v61 = vld [vmem:[%s3520_s1 + $0x748] sm:$0xff] }
  0x44   :  { %1989 = vmatprep.subr.bf16.mxu1 %v1988_v29  ;;  %749 = vmatmul.mubr.f32.vlgmr.msra.gmra.mrb[2].mxu0 %v2581_v33  ;;  %v1994_v33 = vpack.c.bf16 %v184_v46, %v183_v41  ;;  %v160_v29 = vld [vmem:[%s3520_s1 + $0x458] sm:$0xff]  ;;  %v2008_v31 = vpack.c.bf16 %v208_v24, %v207_v23  ;;  %v161_v41 = vld [vmem:[%s3520_s1 + $0x460] sm:$0xff]  ;;  %v239_v62 = vld [vmem:[%s3520_s1 + $0x6d0] sm:$0xff] }
  0x45   :  { %1959 = vmatpush3.bf16.msra.mxu0 %v1958_v35  ;;  %888 = vmatprep.mubr.f32.mxu0 %v467_v51  ;;  %v178_v35 = vld [vmem:[%s3520_s1 + $0x4e8] sm:$0xff]  ;;  %v212_v51 = vld [vmem:[%s3520_s1 + $0x5f8] sm:$0xff]  ;;  %v233_v24 = vld [vmem:[%s3520_s1 + $0x6a0] sm:$0xff] }
  0x46   :  { %819 = vmatmul.mubr.f32.vlgmr.msra.gmra.mrb[2].mxu1 %v2604_v45  ;;  %1961 = vmatprep.subr.bf16.mxu0 %v1960_v38  ;;  %v468_v45 = vcombine.high %v2744_v52, %v2744_v52  ;;  %v1978_v38 = vpack.c.bf16 %v160_v29, %v159_v28  ;;  %v1980_v40 = vpack.c.bf16 %v178_v35, %v177_v34  ;;  %v248_v23 = vld [vmem:[%s3520_s1 + $0x718] sm:$0xff]  ;;  %v266_v28 = vld [vmem:[%s3520_s1 + $0x7a8] sm:$0xff]  ;;  %v249_v35 = vld [vmem:[%s3520_s1 + $0x720] sm:$0xff] }
  0x47   :  { %1991 = vmatpush3.bf16.msra.mxu1 %v1990_v36  ;;  %v209_v36 = vld [vmem:[%s3520_s1 + $0x5e0] sm:$0xff]  ;;  %v218_v34 = vld [vmem:[%s3520_s1 + $0x628] sm:$0xff]  ;;  %v240_v63 = vld [vmem:[%s3520_s1 + $0x6d8] sm:$0xff] }
  0x48   :  { %1993 = vmatprep.subr.bf16.mxu1 %v1992_v44  ;;  %958 = vmatprep.mubr.f32.mxu1 %v468_v45  ;;  %v193_v44 = vld [vmem:[%s3520_s1 + $0x560] sm:$0xff]  ;;  %v2012_v46 = vpack.c.bf16 %v210_v37, %v209_v36  ;;  %v195_v45 = vld [vmem:[%s3520_s1 + $0x570] sm:$0xff]  ;;  %v2040_v4 = vpack.c.bf16 %v240_v63, %v239_v62  ;;  %v256_v9 = vld [vmem:[%s3520_s1 + $0x758] sm:$0xff] }
  0x49   :  { %1963 = vmatpush3.bf16.msra.mxu0 %v1962_v53  ;;  %v1982_v53 = vpack.c.bf16 %v162_v43, %v161_v41  ;;  %v235_v37 = vld [vmem:[%s3520_s1 + $0x6b0] sm:$0xff]  ;;  %v241_v10 = vld [vmem:[%s3520_s1 + $0x6e0] sm:$0xff]  ;;  %v312_v63 = vld [vmem:[%s3520_s1 + $0x918] sm:$0xff] }
  0x4a   :  { %1965 = vmatprep.subr.bf16.mxu0 %v1964_v54  ;;  %v2014_v54 = vpack.c.bf16 %v194_v47, %v193_v44  ;;  %v220_v47 = vld [vmem:[%s3520_s1 + $0x638] sm:$0xff]  ;;  %v223_v5 = vld [vmem:[%s3520_s1 + $0x650] sm:$0xff] }
  0x4b   :  { %1995 = vmatpush3.bf16.msra.mxu1 %v1994_v33  ;;  %v18_v33 = vld [vmem:[%s3519_s0 + $0x18] sm:$0xff]  ;;  %v311_v62 = vld [vmem:[%s3520_s1 + $0x910] sm:$0xff] }
  0x4c   :  { %1997 = vmatprep.subr.bf16.mxu1 %v1996_v58  ;;  %v2016_v58 = vpack.c.bf16 %v212_v51, %v211_v50  ;;  %v2915_v11 = vrot.slane %v18_v33, %v2420_v13  ;;  %v252_v50 = vld [vmem:[%s3520_s1 + $0x738] sm:$0xff]  ;;  %v237_v51 = vld [vmem:[%s3520_s1 + $0x6c0] sm:$0xff] }
  0x4d   :  { %1967 = vmatpush3.bf16.msra.mxu0 %v1966_v0  ;;  %v469_v0 = vcombine.high %v18_v33, %v18_v33  ;;  %v269_v33 = vld [vmem:[%s3520_s1 + $0x7c0] sm:$0xff] }
  0x4e   :  { %1969 = vmatprep.subr.bf16.mxu0 %v1968_v2  ;;  %v2018_v2 = vpack.c.bf16 %v196_v59, %v195_v45  ;;  %v221_v45 = vld [vmem:[%s3520_s1 + $0x640] sm:$0xff] }
  0x4f   :  { %1999 = vmatpush3.bf16.msra.mxu1 %v1998_v1  ;;  %v1986_v1 = vpack.c.bf16 %v164_v57, %v163_v56  ;;  %v2066_v56 = vpack.c.bf16 %v252_v50, %v251_v48  ;;  %v253_v59 = vld [vmem:[%s3520_s1 + $0x740] sm:$0xff]  ;;  %v278_v48 = vld [vmem:[%s3520_s1 + $0x808] sm:$0xff] }
  0x50   :  { %2001 = vmatprep.subr.bf16.mxu1 %v2000_v6  ;;  %v245_v6 = vld [vmem:[%s3520_s1 + $0x700] sm:$0xff] }
  0x51   :  { %1971 = vmatpush3.bf16.msra.mxu0 %v1970_v12  ;;  %v263_v12 = vld [vmem:[%s3520_s1 + $0x790] sm:$0xff]  ;;  %v2054_v17 = vpack.c.bf16 %v246_v8, %v245_v6  ;;  %v224_v6 = vld [vmem:[%s3520_s1 + $0x658] sm:$0xff] }
  0x52   :  { %1973 = vmatprep.subr.bf16.mxu0 %v1972_v15  ;;  %v2924_v15 = vrot.slane %v469_v0, %v2420_v13  ;;  %v271_v0 = vld [vmem:[%s3520_s1 + $0x7d0] sm:$0xff] }
  0x53   :  { %2003 = vmatpush3.bf16.msra.mxu1 %v2002_v14  ;;  %v264_v14 = vld [vmem:[%s3520_s1 + $0x798] sm:$0xff] }
  0x54   :  { %2005 = vmatprep.subr.bf16.mxu1 %v2004_v19  ;;  %v215_v19 = vld [vmem:[%s3520_s1 + $0x610] sm:$0xff]  ;;  %v2056_v22 = vpack.c.bf16 %v264_v14, %v263_v12  ;;  %v485_v29 = vcombine.high %v2924_v15, %v2924_v15  ;;  %v242_v12 = vld [vmem:[%s3520_s1 + $0x6e8] sm:$0xff]  ;;  %v273_v14 = vld [vmem:[%s3520_s1 + $0x7e0] sm:$0xff] }
  0x55   :  { %1975 = vmatpush3.bf16.msra.mxu0 %v1974_v25  ;;  %v234_v25 = vld [vmem:[%s3520_s1 + $0x6a8] sm:$0xff]  ;;  %v2026_v30 = vpack.c.bf16 %v216_v20, %v215_v19  ;;  %v2044_v19 = vpack.c.bf16 %v242_v12, %v241_v10  ;;  %v225_v20 = vld [vmem:[%s3520_s1 + $0x660] sm:$0xff] }
  0x56   :  { %1977 = vmatprep.subr.bf16.mxu0 %v1976_v27  ;;  %v265_v27 = vld [vmem:[%s3520_s1 + $0x7a0] sm:$0xff]  ;;  %v2028_v32 = vpack.c.bf16 %v234_v25, %v233_v24  ;;  %v258_v24 = vld [vmem:[%s3520_s1 + $0x768] sm:$0xff]  ;;  %v243_v25 = vld [vmem:[%s3520_s1 + $0x6f0] sm:$0xff] }
  0x57   :  { %2007 = vmatpush3.bf16.msra.mxu1 %v2006_v26  ;;  %v484_v26 = vcombine.high %v2915_v11, %v2915_v11  ;;  %v2060_v36 = vpack.c.bf16 %v266_v28, %v265_v27  ;;  %v275_v27 = vld [vmem:[%s3520_s1 + $0x7f0] sm:$0xff]  ;;  %v276_v28 = vld [vmem:[%s3520_s1 + $0x7f8] sm:$0xff] }
  0x58   :  { %2009 = vmatprep.subr.bf16.mxu1 %v2008_v31  ;;  %v2058_v31 = vpack.c.bf16 %v248_v23, %v247_v21  ;;  %v226_v21 = vld [vmem:[%s3520_s1 + $0x668] sm:$0xff] }
  0x59   :  { %1979 = vmatpush3.bf16.msra.mxu0 %v1978_v38  ;;  %v236_v38 = vld [vmem:[%s3520_s1 + $0x6b8] sm:$0xff] }
  0x5a   :  { %1981 = vmatprep.subr.bf16.mxu0 %v1980_v40  ;;  %v268_v40 = vld [vmem:[%s3520_s1 + $0x7b8] sm:$0xff]  ;;  %v2032_v44 = vpack.c.bf16 %v236_v38, %v235_v37  ;;  %v293_v37 = vld [vmem:[%s3520_s1 + $0x880] sm:$0xff]  ;;  %v294_v38 = vld [vmem:[%s3520_s1 + $0x888] sm:$0xff] }
  0x5b   :  { %2011 = vmatpush3.bf16.msra.mxu1 %v2010_v39  ;;  %v267_v39 = vld [vmem:[%s3520_s1 + $0x7b0] sm:$0xff] }
  0x5c   :  { %2013 = vmatprep.subr.bf16.mxu1 %v2012_v46  ;;  %v219_v46 = vld [vmem:[%s3520_s1 + $0x630] sm:$0xff]  ;;  %v2064_v49 = vpack.c.bf16 %v268_v40, %v267_v39  ;;  %v325_v39 = vld [vmem:[%s3520_s1 + $0x980] sm:$0xff]  ;;  %v326_v40 = vld [vmem:[%s3520_s1 + $0x988] sm:$0xff] }
  0x5d   :  { %1983 = vmatpush3.bf16.msra.mxu0 %v1982_v53  ;;  %v238_v53 = vld [vmem:[%s3520_s1 + $0x6c8] sm:$0xff]  ;;  %v2116_v50 = vpack.c.bf16 %v326_v40, %v325_v39 }
  0x5e   :  { %1985 = vmatprep.subr.bf16.mxu0 %v1984_v55  ;;  %v2034_v55 = vpack.c.bf16 %v220_v47, %v219_v46  ;;  %v2036_v57 = vpack.c.bf16 %v238_v53, %v237_v51  ;;  %v2084_v46 = vpack.c.bf16 %v294_v38, %v293_v37  ;;  %v277_v47 = vld [vmem:[%s3520_s1 + $0x800] sm:$0xff]  ;;  %v310_v51 = vld [vmem:[%s3520_s1 + $0x908] sm:$0xff]  ;;  %v295_v53 = vld [vmem:[%s3520_s1 + $0x890] sm:$0xff] }
  0x5f   :  { %2015 = vmatpush3.bf16.msra.mxu1 %v2014_v54  ;;  %v270_v54 = vld [vmem:[%s3520_s1 + $0x7c8] sm:$0xff] }
  0x60   :  { %2017 = vmatprep.subr.bf16.mxu1 %v2016_v58  ;;  %v222_v58 = vld [vmem:[%s3520_s1 + $0x648] sm:$0xff]  ;;  %v2068_v60 = vpack.c.bf16 %v270_v54, %v269_v33  ;;  %v296_v33 = vld [vmem:[%s3520_s1 + $0x898] sm:$0xff] }
  0x61   :  { %1987 = vmatpush3.bf16.msra.mxu0 %v1986_v1  ;;  %v272_v1 = vld [vmem:[%s3520_s1 + $0x7d8] sm:$0xff] }
  0x62   :  { %2021 = vmatprep.subr.bf16.mxu0 %v2020_v3  ;;  %v2070_v3 = vpack.c.bf16 %v254_v61, %v253_v59  ;;  %v2072_v8 = vpack.c.bf16 %v272_v1, %v271_v0  ;;  %v280_v61 = vld [vmem:[%s3520_s1 + $0x818] sm:$0xff]  ;;  %v297_v1 = vld [vmem:[%s3520_s1 + $0x8a0] sm:$0xff] }
  0x63   :  { %2019 = vmatpush3.bf16.msra.mxu1 %v2018_v2  ;;  %v2038_v2 = vpack.c.bf16 %v222_v58, %v221_v45  ;;  %v2086_v45 = vpack.c.bf16 %v278_v48, %v277_v47  ;;  %v279_v58 = vld [vmem:[%s3520_s1 + $0x810] sm:$0xff] }
  0x64   :  { %2053 = vmatprep.subr.bf16.mxu1 %v2052_v7  ;;  %889 = vmatmul.mubr.f32.vlgmr.msra.gmra.mrb[4].mxu0 %v2723_v42  ;;  %v217_v42 = vld [vmem:[%s3520_s1 + $0x620] sm:$0xff]  ;;  %v255_v7 = vld [vmem:[%s3520_s1 + $0x750] sm:$0xff] }
  0x65   :  { %2023 = vmatpush3.bf16.msra.mxu0 %v2022_v16  ;;  %1028 = vmatprep.mubr.f32.mxu0 %v484_v26  ;;  %v2030_v41 = vpack.c.bf16 %v218_v34, %v217_v42  ;;  %v274_v16 = vld [vmem:[%s3520_s1 + $0x7e8] sm:$0xff]  ;;  %v244_v26 = vld [vmem:[%s3520_s1 + $0x6f8] sm:$0xff]  ;;  %v227_v42 = vld [vmem:[%s3520_s1 + $0x670] sm:$0xff] }
  0x66   :  { %959 = vmatmul.mubr.f32.vlgmr.msra.gmra.mrb[4].mxu1 %v2744_v52  ;;  %2025 = vmatprep.subr.bf16.mxu0 %v2024_v18  ;;  %v250_v52 = vld [vmem:[%s3520_s1 + $0x728] sm:$0xff]  ;;  %v2074_v18 = vpack.c.bf16 %v256_v9, %v255_v7  ;;  %v2076_v23 = vpack.c.bf16 %v274_v16, %v273_v14  ;;  %v228_v34 = vld [vmem:[%s3520_s1 + $0x678] sm:$0xff] }
  0x67   :  { %2055 = vmatpush3.bf16.msra.mxu1 %v2054_v17  ;;  %1098 = vmatprep.mubr.f32.mxu1 %v485_v29  ;;  %v2062_v43 = vpack.c.bf16 %v250_v52, %v249_v35  ;;  %v2042_v17 = vpack.c.bf16 %v224_v6, %v223_v5  ;;  %v2046_v29 = vpack.c.bf16 %v226_v21, %v225_v20  ;;  %v259_v35 = vld [vmem:[%s3520_s1 + $0x770] sm:$0xff]  ;;  %v260_v52 = vld [vmem:[%s3520_s1 + $0x778] sm:$0xff] }
  0x68   :  { %2057 = vmatprep.subr.bf16.mxu1 %v2056_v22  ;;  %v257_v22 = vld [vmem:[%s3520_s1 + $0x760] sm:$0xff] }
  0x69   :  { %2027 = vmatpush3.bf16.msra.mxu0 %v2026_v30  ;;  %v19_v30 = vld [vmem:[%s3519_s0 + $0x20] sm:$0xff] }
  0x6a   :  { %2029 = vmatprep.subr.bf16.mxu0 %v2028_v32  ;;  %v2048_v32 = vpack.c.bf16 %v244_v26, %v243_v25  ;;  %v3122_v54 = vrot.slane %v19_v30, %v2420_v13 }
  0x6b   :  { %2059 = vmatpush3.bf16.msra.mxu1 %v2058_v31  ;;  %v2078_v31 = vpack.c.bf16 %v258_v24, %v257_v22 }
  0x6c   :  { %2061 = vmatprep.subr.bf16.mxu1 %v2060_v36  ;;  %v2080_v36 = vpack.c.bf16 %v276_v28, %v275_v27 }
  0x6d   :  { %2031 = vmatpush3.bf16.msra.mxu0 %v2030_v41  ;;  %v486_v41 = vcombine.high %v19_v30, %v19_v30 }
  0x6e   :  { %2033 = vmatprep.subr.bf16.mxu0 %v2032_v44  ;;  %v2082_v44 = vpack.c.bf16 %v260_v52, %v259_v35 }
  0x6f   :  { %2063 = vmatpush3.bf16.msra.mxu1 %v2062_v43  ;;  %v2050_v43 = vpack.c.bf16 %v228_v34, %v227_v42 }
  0x70   :  { %2065 = vmatprep.subr.bf16.mxu1 %v2064_v49  ;;  %v309_v49 = vld [vmem:[%s3520_s1 + $0x900] sm:$0xff] }
  0x71   :  { %2035 = vmatpush3.bf16.msra.mxu0 %v2034_v55  ;;  %v327_v55 = vld [vmem:[%s3520_s1 + $0x990] sm:$0xff]  ;;  %v2118_v59 = vpack.c.bf16 %v310_v51, %v309_v49 }
  0x72   :  { %2037 = vmatprep.subr.bf16.mxu0 %v2036_v57  ;;  %v3131_v57 = vrot.slane %v486_v41, %v2420_v13 }
  0x73   :  { %2067 = vmatpush3.bf16.msra.mxu1 %v2066_v56  ;;  %v328_v56 = vld [vmem:[%s3520_s1 + $0x998] sm:$0xff] }
  0x74   :  { %2069 = vmatprep.subr.bf16.mxu1 %v2068_v60  ;;  %v2088_v60 = vpack.c.bf16 %v296_v33, %v295_v53  ;;  %v2120_v0 = vpack.c.bf16 %v328_v56, %v327_v55 }
  0x75   :  { %2039 = vmatpush3.bf16.msra.mxu0 %v2038_v2  ;;  %v298_v2 = vld [vmem:[%s3520_s1 + $0x8a8] sm:$0xff] }
  0x76   :  { %2041 = vmatprep.subr.bf16.mxu0 %v2040_v4 }
  0x77   :  { %2071 = vmatpush3.bf16.msra.mxu1 %v2070_v3  ;;  %v501_v3 = vcombine.high %v3122_v54, %v3122_v54 }
  0x78   :  { %2073 = vmatprep.subr.bf16.mxu1 %v2072_v8 }
  0x79   :  { %2043 = vmatpush3.bf16.msra.mxu0 %v2042_v17 }
  0x7a   :  { %2045 = vmatprep.subr.bf16.mxu0 %v2044_v19 }
  0x7b   :  { %2075 = vmatpush3.bf16.msra.mxu1 %v2074_v18 }
  0x7c   :  { %2077 = vmatprep.subr.bf16.mxu1 %v2076_v23 }
  0x7d   :  { %2047 = vmatpush3.bf16.msra.mxu0 %v2046_v29 }
  0x7e   :  { %2049 = vmatprep.subr.bf16.mxu0 %v2048_v32 }
  0x7f   :  { %2079 = vmatpush3.bf16.msra.mxu1 %v2078_v31 }
  0x80   :  { %2081 = vmatprep.subr.bf16.mxu1 %v2080_v36 }
  0x81   :  { %2051 = vmatpush3.bf16.msra.mxu0 %v2050_v43 }
  0x82   :  { %2085 = vmatprep.subr.bf16.mxu0 %v2084_v46 }
  0x83   :  { %2083 = vmatpush3.bf16.msra.mxu1 %v2082_v44 }
  0x84   :  { %2117 = vmatprep.subr.bf16.mxu1 %v2116_v50 }
  0x85   :  { %8 = vsyncpa [#allocation3], 0  ;;  %1029 = vmatmul.mubr.f32.vlgmr.msra.gmra.mrb[6].mxu0 %v2915_v11  ;;  %v329_v4 = vld [vmem:[%s3520_s1 + $0x9a0] sm:$0xff]  ;;  %v330_v5 = vld [vmem:[%s3520_s1 + $0x9a8] sm:$0xff]  ;;  %v502_v6 = vcombine.high %v3131_v57, %v3131_v57  ;;  %v2090_v7 = vpack.c.bf16 %v280_v61, %v279_v58  ;;  %v2122_v8 = vpack.c.bf16 %v312_v63, %v311_v62  ;;  %v2092_v9 = vpack.c.bf16 %v298_v2, %v297_v1 }
  0x86   :  { %2087 = vmatpush3.bf16.msra.mxu0 %v2086_v45  ;;  %1099 = vmatmul.mubr.f32.vlgmr.msra.gmra.mrb[6].mxu1 %v2924_v15  ;;  %v281_v11 = vld [vmem:[%s3520_s1 + $0x820] sm:$0xff]  ;;  %v282_v10 = vld [vmem:[%s3520_s1 + $0x828] sm:$0xff]  ;;  %v2124_v14 = vpack.c.bf16 %v330_v5, %v329_v4  ;;  %v299_v16 = vld [vmem:[%s3520_s1 + $0x8b0] sm:$0xff]  ;;  %vm1390_vm0 = vcmask 74752  }
  0x87   :  { %2119 = vmatpush3.bf16.msra.mxu1 %v2118_v59  ;;  %2089 = vmatprep.subr.bf16.mxu0 %v2088_v60  ;;  %v313_v12 = vld [vmem:[%s3520_s1 + $0x920] sm:$0xff]  ;;  %v314_v15 = vld [vmem:[%s3520_s1 + $0x928] sm:$0xff]  ;;  %v300_v17 = vld [vmem:[%s3520_s1 + $0x8b8] sm:$0xff]  ;;  %v2094_v20 = vpack.c.bf16 %v282_v10, %v281_v11 }
  0x88   :  { %2121 = vmatprep.subr.bf16.mxu1 %v2120_v0  ;;  %1168 = vmatprep.mubr.f32.mxu0 %v501_v3  ;;  %v331_v18 = vld [vmem:[%s3520_s1 + $0x9b0] sm:$0xff]  ;;  %v332_v19 = vld [vmem:[%s3520_s1 + $0x9b8] sm:$0xff]  ;;  %v2126_v21 = vpack.c.bf16 %v314_v15, %v313_v12  ;;  %v2096_v22 = vpack.c.bf16 %v300_v17, %v299_v16  ;;  %v301_v28 = vld [vmem:[%s3520_s1 + $0x8c0] sm:$0xff] }
  0x89   :  { %1238 = vmatprep.mubr.f32.mxu1 %v502_v6  ;;  %v283_v23 = vld [vmem:[%s3520_s1 + $0x830] sm:$0xff]  ;;  %v284_v24 = vld [vmem:[%s3520_s1 + $0x838] sm:$0xff]  ;;  %v2128_v26 = vpack.c.bf16 %v332_v19, %v331_v18  ;;  %v302_v29 = vld [vmem:[%s3520_s1 + $0x8c8] sm:$0xff] }
  0x8a   :  { %2091 = vmatpush3.bf16.msra.mxu0 %v2090_v7  ;;  %v315_v25 = vld [vmem:[%s3520_s1 + $0x930] sm:$0xff]  ;;  %v316_v27 = vld [vmem:[%s3520_s1 + $0x938] sm:$0xff]  ;;  %v333_v30 = vld [vmem:[%s3520_s1 + $0x9c0] sm:$0xff]  ;;  %v2098_v32 = vpack.c.bf16 %v284_v24, %v283_v23  ;;  %v2100_v34 = vpack.c.bf16 %v302_v29, %v301_v28 }
  0x8b   :  { %2123 = vmatpush3.bf16.msra.mxu1 %v2122_v8  ;;  %2093 = vmatprep.subr.bf16.mxu0 %v2092_v9  ;;  %v334_v31 = vld [vmem:[%s3520_s1 + $0x9c8] sm:$0xff]  ;;  %v2130_v42 = vpack.c.bf16 %v316_v27, %v315_v25  ;;  %v285_v35 = vld [vmem:[%s3520_s1 + $0x840] sm:$0xff]  ;;  %v303_v39 = vld [vmem:[%s3520_s1 + $0x8d0] sm:$0xff] }
  0x8c   :  { %2125 = vmatprep.subr.bf16.mxu1 %v2124_v14  ;;  %v286_v36 = vld [vmem:[%s3520_s1 + $0x848] sm:$0xff]  ;;  %v317_v52 = vld [vmem:[%s3520_s1 + $0x940] sm:$0xff]  ;;  %v2132_v37 = vpack.c.bf16 %v334_v31, %v333_v30  ;;  %v304_v40 = vld [vmem:[%s3520_s1 + $0x8d8] sm:$0xff] }
  0x8d   :  { %v318_v38 = vld [vmem:[%s3520_s1 + $0x948] sm:$0xff]  ;;  %v335_v41 = vld [vmem:[%s3520_s1 + $0x9d0] sm:$0xff]  ;;  %v336_v43 = vld [vmem:[%s3520_s1 + $0x9d8] sm:$0xff]  ;;  %v2102_v44 = vpack.c.bf16 %v286_v36, %v285_v35  ;;  %v2104_v47 = vpack.c.bf16 %v304_v40, %v303_v39 }
  0x8e   :  { %2095 = vmatpush3.bf16.msra.mxu0 %v2094_v20  ;;  %v2134_v46 = vpack.c.bf16 %v318_v38, %v317_v52  ;;  %v287_v48 = vld [vmem:[%s3520_s1 + $0x850] sm:$0xff]  ;;  %v288_v49 = vld [vmem:[%s3520_s1 + $0x858] sm:$0xff]  ;;  %v2136_v51 = vpack.c.bf16 %v336_v43, %v335_v41  ;;  %v305_v33 = vld [vmem:[%s3520_s1 + $0x8e0] sm:$0xff] }
  0x8f   :  { %2127 = vmatpush3.bf16.msra.mxu1 %v2126_v21  ;;  %2097 = vmatprep.subr.bf16.mxu0 %v2096_v22  ;;  %v319_v50 = vld [vmem:[%s3520_s1 + $0x950] sm:$0xff]  ;;  %v320_v53 = vld [vmem:[%s3520_s1 + $0x958] sm:$0xff]  ;;  %v306_v55 = vld [vmem:[%s3520_s1 + $0x8e8] sm:$0xff]  ;;  %v2106_v58 = vpack.c.bf16 %v288_v49, %v287_v48 }
  0x90   :  { %2129 = vmatprep.subr.bf16.mxu1 %v2128_v26  ;;  %v337_v56 = vld [vmem:[%s3520_s1 + $0x9e0] sm:$0xff]  ;;  %v338_v45 = vld [vmem:[%s3520_s1 + $0x9e8] sm:$0xff]  ;;  %v2138_v59 = vpack.c.bf16 %v320_v53, %v319_v50  ;;  %v2108_v60 = vpack.c.bf16 %v306_v55, %v305_v33  ;;  %v307_v2 = vld [vmem:[%s3520_s1 + $0x8f0] sm:$0xff] }
  0x91   :  { %v289_v61 = vld [vmem:[%s3520_s1 + $0x860] sm:$0xff]  ;;  %v290_v62 = vld [vmem:[%s3520_s1 + $0x868] sm:$0xff]  ;;  %v2140_v0 = vpack.c.bf16 %v338_v45, %v337_v56  ;;  %v308_v3 = vld [vmem:[%s3520_s1 + $0x8f8] sm:$0xff] }
  0x92   :  { %2099 = vmatpush3.bf16.msra.mxu0 %v2098_v32  ;;  %v321_v63 = vld [vmem:[%s3520_s1 + $0x960] sm:$0xff]  ;;  %v322_v1 = vld [vmem:[%s3520_s1 + $0x968] sm:$0xff]  ;;  %v339_v4 = vld [vmem:[%s3520_s1 + $0x9f0] sm:$0xff]  ;;  %v2110_v6 = vpack.c.bf16 %v290_v62, %v289_v61  ;;  %v2112_v9 = vpack.c.bf16 %v308_v3, %v307_v2 }
  0x93   :  { %2131 = vmatpush3.bf16.msra.mxu1 %v2130_v42  ;;  %2101 = vmatprep.subr.bf16.mxu0 %v2100_v34  ;;  %v340_v5 = vld [vmem:[%s3520_s1 + $0x9f8] sm:$0xff]  ;;  %v20_v7 = vld [vmem:[%s3519_s0 + $0x28] sm:$0xff]  ;;  %v2142_v8 = vpack.c.bf16 %v322_v1, %v321_v63  ;;  %v291_v11 = vld [vmem:[%s3520_s1 + $0x870] sm:$0xff] }
  0x94   :  { %2133 = vmatprep.subr.bf16.mxu1 %v2132_v37  ;;  %v292_v10 = vld [vmem:[%s3520_s1 + $0x878] sm:$0xff]  ;;  %v323_v12 = vld [vmem:[%s3520_s1 + $0x970] sm:$0xff]  ;;  %v2144_v14 = vpack.c.bf16 %v340_v5, %v339_v4  ;;  %v357_v16 = vld [vmem:[%s3520_s1 + $0xa80] sm:$0xff]  ;;  %v503_v20 = vcombine.high %v20_v7, %v20_v7  ;;  %v3329_v31 = vrot.slane %v20_v7, %v2420_v13 }
  0x95   :  { %v324_v15 = vld [vmem:[%s3520_s1 + $0x978] sm:$0xff]  ;;  %v358_v17 = vld [vmem:[%s3520_s1 + $0xa88] sm:$0xff]  ;;  %v389_v18 = vld [vmem:[%s3520_s1 + $0xb80] sm:$0xff]  ;;  %v2114_v21 = vpack.c.bf16 %v292_v10, %v291_v11 }
  0x96   :  { %2103 = vmatpush3.bf16.msra.mxu0 %v2102_v44  ;;  %v390_v19 = vld [vmem:[%s3520_s1 + $0xb88] sm:$0xff]  ;;  %v2146_v22 = vpack.c.bf16 %v324_v15, %v323_v12  ;;  %v2148_v23 = vpack.c.bf16 %v358_v17, %v357_v16  ;;  %v341_v24 = vld [vmem:[%s3520_s1 + $0xa00] sm:$0xff]  ;;  %v359_v29 = vld [vmem:[%s3520_s1 + $0xa90] sm:$0xff]  ;;  %v3338_v34 = vrot.slane %v503_v20, %v2420_v13  ;;  %v518_v44 = vcombine.high %v3329_v31, %v3329_v31 }
  0x97   :  { %2135 = vmatpush3.bf16.msra.mxu1 %v2134_v46  ;;  %2105 = vmatprep.subr.bf16.mxu0 %v2104_v47  ;;  %v342_v25 = vld [vmem:[%s3520_s1 + $0xa08] sm:$0xff]  ;;  %v373_v26 = vld [vmem:[%s3520_s1 + $0xb00] sm:$0xff]  ;;  %v2180_v27 = vpack.c.bf16 %v390_v19, %v389_v18  ;;  %v360_v30 = vld [vmem:[%s3520_s1 + $0xa98] sm:$0xff] }
  0x98   :  { %2137 = vmatprep.subr.bf16.mxu1 %v2136_v51  ;;  %v374_v28 = vld [vmem:[%s3520_s1 + $0xb08] sm:$0xff]  ;;  %v391_v32 = vld [vmem:[%s3520_s1 + $0xb90] sm:$0xff]  ;;  %v392_v42 = vld [vmem:[%s3520_s1 + $0xb98] sm:$0xff]  ;;  %v2150_v35 = vpack.c.bf16 %v342_v25, %v341_v24  ;;  %v2152_v52 = vpack.c.bf16 %v360_v30, %v359_v29  ;;  %v519_v48 = vcombine.high %v3338_v34, %v3338_v34 }
  0x99   :  { %v2182_v36 = vpack.c.bf16 %v374_v28, %v373_v26  ;;  %v343_v37 = vld [vmem:[%s3520_s1 + $0xa10] sm:$0xff]  ;;  %v344_v38 = vld [vmem:[%s3520_s1 + $0xa18] sm:$0xff]  ;;  %v2184_v13 = vpack.c.bf16 %v392_v42, %v391_v32  ;;  %v361_v41 = vld [vmem:[%s3520_s1 + $0xaa0] sm:$0xff] }
  0x9a   :  { %2107 = vmatpush3.bf16.msra.mxu0 %v2106_v58  ;;  %v375_v39 = vld [vmem:[%s3520_s1 + $0xb10] sm:$0xff]  ;;  %v376_v40 = vld [vmem:[%s3520_s1 + $0xb18] sm:$0xff]  ;;  %v362_v43 = vld [vmem:[%s3520_s1 + $0xaa8] sm:$0xff]  ;;  %v2154_v49 = vpack.c.bf16 %v344_v38, %v343_v37 }
  0x9b   :  { %2139 = vmatpush3.bf16.msra.mxu1 %v2138_v59  ;;  %2109 = vmatprep.subr.bf16.mxu0 %v2108_v60  ;;  %v393_v46 = vld [vmem:[%s3520_s1 + $0xba0] sm:$0xff]  ;;  %v394_v47 = vld [vmem:[%s3520_s1 + $0xba8] sm:$0xff]  ;;  %v2186_v50 = vpack.c.bf16 %v376_v40, %v375_v39  ;;  %v2156_v51 = vpack.c.bf16 %v362_v43, %v361_v41  ;;  %v363_v56 = vld [vmem:[%s3520_s1 + $0xab0] sm:$0xff] }
  0x9c   :  { %2141 = vmatprep.subr.bf16.mxu1 %v2140_v0  ;;  %v346_v53 = vld [vmem:[%s3520_s1 + $0xa28] sm:$0xff]  ;;  %v377_v33 = vld [vmem:[%s3520_s1 + $0xb20] sm:$0xff]  ;;  %v2188_v55 = vpack.c.bf16 %v394_v47, %v393_v46  ;;  %v364_v45 = vld [vmem:[%s3520_s1 + $0xab8] sm:$0xff] }
  0x9d   :  { %v395_v58 = vld [vmem:[%s3520_s1 + $0xbb0] sm:$0xff]  ;;  %v396_v59 = vld [vmem:[%s3520_s1 + $0xbb8] sm:$0xff]  ;;  %v2160_v62 = vpack.c.bf16 %v364_v45, %v363_v56  ;;  %v365_v4 = vld [vmem:[%s3520_s1 + $0xac0] sm:$0xff] }
  0x9e   :  { %2111 = vmatpush3.bf16.msra.mxu0 %v2110_v6  ;;  %v347_v63 = vld [vmem:[%s3520_s1 + $0xa30] sm:$0xff]  ;;  %v348_v0 = vld [vmem:[%s3520_s1 + $0xa38] sm:$0xff]  ;;  %v2192_v2 = vpack.c.bf16 %v396_v59, %v395_v58  ;;  %v366_v5 = vld [vmem:[%s3520_s1 + $0xac8] sm:$0xff] }
  0x9f   :  { %2143 = vmatpush3.bf16.msra.mxu1 %v2142_v8  ;;  %2113 = vmatprep.subr.bf16.mxu0 %v2112_v9  ;;  %v379_v1 = vld [vmem:[%s3520_s1 + $0xb30] sm:$0xff]  ;;  %v380_v3 = vld [vmem:[%s3520_s1 + $0xb38] sm:$0xff]  ;;  %v397_v6 = vld [vmem:[%s3520_s1 + $0xbc0] sm:$0xff]  ;;  %v2162_v8 = vpack.c.bf16 %v348_v0, %v347_v63  ;;  %v2164_v11 = vpack.c.bf16 %v366_v5, %v365_v4 }
  0xa0   :  { %2145 = vmatprep.subr.bf16.mxu1 %v2144_v14  ;;  %v398_v7 = vld [vmem:[%s3520_s1 + $0xbc8] sm:$0xff]  ;;  %v2194_v9 = vpack.c.bf16 %v380_v3, %v379_v1  ;;  %v349_v10 = vld [vmem:[%s3520_s1 + $0xa40] sm:$0xff]  ;;  %v367_v17 = vld [vmem:[%s3520_s1 + $0xad0] sm:$0xff] }
  0xa1   :  { %v350_v12 = vld [vmem:[%s3520_s1 + $0xa48] sm:$0xff]  ;;  %v381_v14 = vld [vmem:[%s3520_s1 + $0xb40] sm:$0xff]  ;;  %v2196_v15 = vpack.c.bf16 %v398_v7, %v397_v6  ;;  %v368_v18 = vld [vmem:[%s3520_s1 + $0xad8] sm:$0xff] }
  0xa2   :  { %2115 = vmatpush3.bf16.msra.mxu0 %v2114_v21  ;;  %v382_v16 = vld [vmem:[%s3520_s1 + $0xb48] sm:$0xff]  ;;  %v399_v19 = vld [vmem:[%s3520_s1 + $0xbd0] sm:$0xff]  ;;  %v400_v20 = vld [vmem:[%s3520_s1 + $0xbd8] sm:$0xff]  ;;  %v2166_v21 = vpack.c.bf16 %v350_v12, %v349_v10 }
  0xa3   :  { %2147 = vmatpush3.bf16.msra.mxu1 %v2146_v22  ;;  %2149 = vmatprep.subr.bf16.mxu0 %v2148_v23  ;;  %v2198_v22 = vpack.c.bf16 %v382_v16, %v381_v14  ;;  %v2168_v23 = vpack.c.bf16 %v368_v18, %v367_v17  ;;  %v351_v24 = vld [vmem:[%s3520_s1 + $0xa50] sm:$0xff]  ;;  %v352_v25 = vld [vmem:[%s3520_s1 + $0xa58] sm:$0xff]  ;;  %v369_v29 = vld [vmem:[%s3520_s1 + $0xae0] sm:$0xff] }
  0xa4   :  { %2181 = vmatprep.subr.bf16.mxu1 %v2180_v27  ;;  %v383_v26 = vld [vmem:[%s3520_s1 + $0xb50] sm:$0xff]  ;;  %v2200_v27 = vpack.c.bf16 %v400_v20, %v399_v19  ;;  %v384_v28 = vld [vmem:[%s3520_s1 + $0xb58] sm:$0xff]  ;;  %v370_v30 = vld [vmem:[%s3520_s1 + $0xae8] sm:$0xff] }
  0xa5   :  { %1169 = vmatmul.mubr.f32.vlgmr.msra.gmra.mrb[8].mxu0 %v3122_v54  ;;  %v345_v54 = vld [vmem:[%s3520_s1 + $0xa20] sm:$0xff]  ;;  %v402_v42 = vld [vmem:[%s3520_s1 + $0xbe8] sm:$0xff]  ;;  %v371_v41 = vld [vmem:[%s3520_s1 + $0xaf0] sm:$0xff] }
  0xa6   :  { %2151 = vmatpush3.bf16.msra.mxu0 %v2150_v35  ;;  %1239 = vmatmul.mubr.f32.vlgmr.msra.gmra.mrb[8].mxu1 %v3131_v57  ;;  %v378_v57 = vld [vmem:[%s3520_s1 + $0xb28] sm:$0xff]  ;;  %v2158_v60 = vpack.c.bf16 %v346_v53, %v345_v54  ;;  %v401_v32 = vld [vmem:[%s3520_s1 + $0xbe0] sm:$0xff]  ;;  %v2170_v35 = vpack.c.bf16 %v352_v25, %v351_v24  ;;  %v372_v43 = vld [vmem:[%s3520_s1 + $0xaf8] sm:$0xff] }
  0xa7   :  { %2183 = vmatpush3.bf16.msra.mxu1 %v2182_v36  ;;  %2153 = vmatprep.subr.bf16.mxu0 %v2152_v52  ;;  %v2190_v61 = vpack.c.bf16 %v378_v57, %v377_v33  ;;  %v2202_v36 = vpack.c.bf16 %v384_v28, %v383_v26  ;;  %v2172_v52 = vpack.c.bf16 %v370_v30, %v369_v29  ;;  %v353_v37 = vld [vmem:[%s3520_s1 + $0xa60] sm:$0xff]  ;;  %v354_v38 = vld [vmem:[%s3520_s1 + $0xa68] sm:$0xff]  ;;  %v404_v46 = vld [vmem:[%s3520_s1 + $0xbf8] sm:$0xff] }
  0xa8   :  { %2185 = vmatprep.subr.bf16.mxu1 %v2184_v13  ;;  %1308 = vmatprep.mubr.f32.mxu0 %v518_v44  ;;  %v385_v39 = vld [vmem:[%s3520_s1 + $0xb60] sm:$0xff]  ;;  %v2204_v13 = vpack.c.bf16 %v402_v42, %v401_v32  ;;  %v386_v40 = vld [vmem:[%s3520_s1 + $0xb68] sm:$0xff]  ;;  %v403_v44 = vld [vmem:[%s3520_s1 + $0xbf0] sm:$0xff]  ;;  %v2174_v47 = vpack.c.bf16 %v354_v38, %v353_v37 }
  0xa9   :  { %1378 = vmatprep.mubr.f32.mxu1 %v519_v48  ;;  %v2206_v48 = vpack.c.bf16 %v386_v40, %v385_v39  ;;  %v2208_v54 = vpack.c.bf16 %v404_v46, %v403_v44  ;;  %v387_v53 = vld [vmem:[%s3520_s1 + $0xb70] sm:$0xff]  ;;  %v388_v33 = vld [vmem:[%s3520_s1 + $0xb78] sm:$0xff]  ;;  %v1406_v45 = vld [vmem:[%s3521_s2] ss:$0 sm:$0xff] }
  0xaa   :  { %2155 = vmatpush3.bf16.msra.mxu0 %v2154_v49  ;;  %v2176_v49 = vpack.c.bf16 %v372_v43, %v371_v41  ;;  %v2210_v57 = vpack.c.bf16 %v388_v33, %v387_v53 }
  0xab   :  { %2187 = vmatpush3.bf16.msra.mxu1 %v2186_v50  ;;  %2157 = vmatprep.subr.bf16.mxu0 %v2156_v51  ;;  %v355_v50 = vld [vmem:[%s3520_s1 + $0xa70] sm:$0xff]  ;;  %v356_v51 = vld [vmem:[%s3520_s1 + $0xa78] sm:$0xff]  ;;  %s2249_s1 = smov [#allocation2]  }
  0xac   :  { %2189 = vmatprep.subr.bf16.mxu1 %v2188_v55  ;;  %v2178_v55 = vpack.c.bf16 %v356_v51, %v355_v50  ;;  %s1398_s2 = sshll.u32 %s2249_s1, 4  ;;  %s1399_s2 = int_to_ptr.vmem [resolvable:$true] %s1398_s2 }
  0xad   :  { %s2224_s6 = scalar_lea.vmem %s1399_s2, 32  ;;  %p2229_p1 = scmp.lt.s32.totalorder %s1399_s2, %s1399_s2 }
  0xae   :  { %2159 = vmatpush3.bf16.msra.mxu0 %v2158_v60  ;;  %p2225_p0 = scmp.ne.s32.totalorder %s1399_s2, %s2224_s6  ;;  %p2230_p2 = scmp.lt.s32.totalorder %s2224_s6, %s2224_s6 }
  0xaf   :  { %2191 = vmatpush3.bf16.msra.mxu1 %v2190_v61  ;;  %2161 = vmatprep.subr.bf16.mxu0 %v2160_v62 }
  0xb0   :  { %2193 = vmatprep.subr.bf16.mxu1 %v2192_v2  ;;  %p2231_p3 = por %p2230_p2, %p2229_p1 }
  0xb2   :  { %2163 = vmatpush3.bf16.msra.mxu0 %v2162_v8  ;;  %p2232_p4 = pnand %p2231_p3, %p2225_p0 }
  0xb3   :  { %2195 = vmatpush3.bf16.msra.mxu1 %v2194_v9  ;;  %2165 = vmatprep.subr.bf16.mxu0 %v2164_v11 }
  0xb4   :  { %2197 = vmatprep.subr.bf16.mxu1 %v2196_v15 }
  0xb6   :  { %2167 = vmatpush3.bf16.msra.mxu0 %v2166_v21 }
  0xb7   :  { %2199 = vmatpush3.bf16.msra.mxu1 %v2198_v22  ;;  %2169 = vmatprep.subr.bf16.mxu0 %v2168_v23 }
  0xb8   :  { %2201 = vmatprep.subr.bf16.mxu1 %v2200_v27 }
  0xba   :  { %2171 = vmatpush3.bf16.msra.mxu0 %v2170_v35 }
  0xbb   :  { %2203 = vmatpush3.bf16.msra.mxu1 %v2202_v36  ;;  %2173 = vmatprep.subr.bf16.mxu0 %v2172_v52 }
  0xbc   :  { %2205 = vmatprep.subr.bf16.mxu1 %v2204_v13 }
  0xbe   :  { %2175 = vmatpush3.bf16.msra.mxu0 %v2174_v47 }
  0xbf   :  { %2207 = vmatpush3.bf16.msra.mxu1 %v2206_v48  ;;  %2177 = vmatprep.subr.bf16.mxu0 %v2176_v49 }
  0xc0   :  { %2209 = vmatprep.subr.bf16.mxu1 %v2208_v54 }
  0xc2   :  { %2179 = vmatpush3.bf16.msra.mxu0 %v2178_v55 }
  0xc3   :  { %2211 = vmatpush3.bf16.msra.mxu1 %v2210_v57 }
  0xc5   :  { %1309 = vmatmul.mubr.f32.vlgmr.msra.gmra.mrb[10].mxu0 %v3329_v31 }
  0xc6   :  { %1379 = vmatmul.mubr.f32.vlgmr.msra.gmra.mrb[10].mxu1 %v3338_v34 }
  0xf7   :  { %v1440_v56 = vpop.f32.mrb[0].mxu0 }
  0xf8   :  { %v1441_v58 = vpop.f32.mrb[1].mxu0 }
  0xf9   :  { %v1475_v59 = vpop.f32.mrb[0].mxu1  ;;  %v1442_v60 = vadd.f32 %v1441_v58, %v1440_v56 }
  0xfa   :  { %v1476_v61 = vpop.f32.mrb[1].mxu1 }
  0xfb   :  { %v1477_v62 = vadd.f32 %v1476_v61, %v1475_v59  ;;  %v611_v63 = vadd.f32 %v1442_v60, %v1406_v45 }
  0xfd   :  { %v681_v0 = vadd.f32 %v1477_v62, %v611_v63 }
 0x117   :  { %v1510_v1 = vpop.f32.mrb[2].mxu0 }
 0x118   :  { %v1511_v2 = vpop.f32.mrb[3].mxu0 }
 0x119   :  { %v1545_v3 = vpop.f32.mrb[2].mxu1  ;;  %v1512_v4 = vadd.f32 %v1511_v2, %v1510_v1 }
 0x11a   :  { %v1546_v5 = vpop.f32.mrb[3].mxu1 }
 0x11b   :  { %v1547_v31 = vadd.f32 %v1546_v5, %v1545_v3  ;;  %v751_v6 = vadd.f32 %v1512_v4, %v681_v0 }
 0x11d   :  { %v821_v34 = vadd.f32 %v1547_v31, %v751_v6 }
 0x137   :  { %v1580_v7 = vpop.f32.mrb[4].mxu0 }
 0x138   :  { %v1581_v8 = vpop.f32.mrb[5].mxu0 }
 0x139   :  { %v1615_v9 = vpop.f32.mrb[4].mxu1  ;;  %v1582_v11 = vadd.f32 %v1581_v8, %v1580_v7 }
 0x13a   :  { %v1616_v10 = vpop.f32.mrb[5].mxu1 }
 0x13b   :  { %v1617_v12 = vadd.f32 %v1616_v10, %v1615_v9  ;;  %v891_v14 = vadd.f32 %v1582_v11, %v821_v34 }
 0x13d   :  { %v961_v15 = vadd.f32 %v1617_v12, %v891_v14 }
 0x158   :  { %v1650_v16 = vpop.f32.mrb[6].mxu0 }
 0x159   :  { %v1651_v17 = vpop.f32.mrb[7].mxu0  ;;  %v1685_v18 = vpop.f32.mrb[6].mxu1 }
 0x15a   :  { %v1652_v19 = vadd.f32 %v1651_v17, %v1650_v16  ;;  %v1686_v20 = vpop.f32.mrb[7].mxu1 }
 0x15b   :  { %v1687_v21 = vadd.f32 %v1686_v20, %v1685_v18 }
 0x15c   :  { %v1031_v22 = vadd.f32 %v1652_v19, %v961_v15 }
 0x15e   :  { %v1101_v23 = vadd.f32 %v1687_v21, %v1031_v22 }
 0x178   :  { %v1720_v24 = vpop.f32.mrb[8].mxu0 }
 0x179   :  { %v1721_v25 = vpop.f32.mrb[9].mxu0  ;;  %v1755_v26 = vpop.f32.mrb[8].mxu1 }
 0x17a   :  { %v1722_v27 = vadd.f32 %v1721_v25, %v1720_v24  ;;  %v1756_v28 = vpop.f32.mrb[9].mxu1 }
 0x17b   :  { %v1757_v29 = vadd.f32 %v1756_v28, %v1755_v26 }
 0x17c   :  { %v1171_v30 = vadd.f32 %v1722_v27, %v1101_v23 }
 0x17e   :  { %v1241_v32 = vadd.f32 %v1757_v29, %v1171_v30 }
 0x198   :  { %v1790_v42 = vpop.f32.mrb[10].mxu0 }
 0x199   :  { %v1791_v35 = vpop.f32.mrb[11].mxu0  ;;  %v1825_v36 = vpop.f32.mrb[10].mxu1 }
 0x19a   :  { %v1792_v52 = vadd.f32 %v1791_v35, %v1790_v42  ;;  %v1826_v37 = vpop.f32.mrb[11].mxu1 }
 0x19b   :  { %v1827_v38 = vadd.f32 %v1826_v37, %v1825_v36 }
 0x19c   :  { %v1311_v39 = vadd.f32 %v1792_v52, %v1241_v32 }
 0x19e   :  { %v1381_v13 = vadd.f32 %v1827_v38, %v1311_v39 }
 0x1a0   :  { %v1407_v40 = vmul.f32 -1.442695, %v1381_v13 }
 0x1a2   :  { %2220 = vpow2.f32 %v1407_v40 }
 0x1ac   :  { %v2221_v41 = vpop.eup %2220 }
 0x1ad   :  { %v1387_v43 = vadd.f32 1.0, %v2221_v41 }
 0x1af   :  { %2222 = vrcp.f32 %v1387_v43 }
 0x1b9   :  { %v2223_v44 = vpop.eup %2222 }
 0x1ba   :  { %1391 = vst.msk [vmem:[#allocation2] sm:$0x3] %vm1390_vm0, %v2223_v44 }
 0x1bb   :  { %2235 = shalt.err (!%p2232_p4)
}
 0x1bc   :  { %s2236_s9 = scalar_lea.hbm %s3522_s3, 32 }
 0x1bd   :  { %p2237_p5 = scmp.ne.s32.totalorder %s3522_s3, %s2236_s9  ;;  %p2240_p6 = scmp.lt.u32.totalorder %s2236_s9, %s3522_s3 }
 0x1bf   :  { %p2242_p7 = pnand %p2240_p6, %p2237_p5 }
 0x1c1   :  { %2245 = shalt.err (!%p2242_p7)
}
 0x1c2   :  { %1401 = dma.vmem_to_hbm [thread:$0]  %s1399_s2, 32, %s3522_s3, [#allocation3]  }
 0x1c3   :  { %2246 = dma.done.wait [#allocation3], 32  }
 0x1c4   :  { %2247 = vsyncadd [#allocation3], 4294967264 }
 0x1c5   :  { %1405 = vsyncpa [#allocation3], 1 }

</bundles_post_ra>
